<compile_context>
chip_gen: v5e
topology: v5e:2x2
jax: 0.10.0
libtpu: 0.0.40
codegen_flags: <defaults>
</compile_context>

<pallas_src>
from functools import partial

import numpy as np
import jax
import jax.numpy as jnp
from jax import lax
from jax.experimental import pallas as pl
from jax.experimental.pallas import tpu as pltpu

# ----------------------------- model hyper-params ---------------------------------
Z_DIM = 32      # latent z
C_DIM = 16      # conditioning c (camera params in EG3D)
W_DIM = 32      # intermediate latent w
CH = 32         # feature channels at every resolution (small synthetic net)
IMG_CH = 3
RGB_PAD = 8     # toRGB output channels padded 3 -> 8 (denser stores / nicer tiles)
NUM_WS = 8      # b4:(conv1,torgb) b8:(conv0,conv1,torgb) b16:(conv0,conv1,torgb)
N_CONV = 5      # number of 3x3 modulated convs
MAX_HW = 256    # largest resolution pixel count (16*16)
LRELU_GAIN = 1.4142135623730951
DEMOD_EPS = 1e-8


# ================================ mapping kernel ===================================
def mapping_kernel(z_ref, c_ref, w0z_ref, w0c_ref, b0_ref, w1_ref, b1_ref,
                   w2_ref, b2_ref, wavg_ref, o_ref, *, truncation):
    """Fused mapping MLP: z-normalize -> 3 linears (lrelu on first two) -> truncation."""
    z = z_ref[...]                                                   # (B, Z)
    zn = z * lax.rsqrt(jnp.mean(z * z, axis=1, keepdims=True) + 1e-8)
    # first layer: x = [zn, c.repeat(B)] @ W0.T  ==  zn @ W0z.T + c @ W0c.T (broadcast)
    h = (jnp.dot(zn, w0z_ref[...], preferred_element_type=jnp.float32)
         + jnp.dot(c_ref[...], w0c_ref[...], preferred_element_type=jnp.float32)
         + b0_ref[...])
    h = jnp.maximum(h, 0.2 * h) * LRELU_GAIN
    h = jnp.dot(h, w1_ref[...], preferred_element_type=jnp.float32) + b1_ref[...]
    h = jnp.maximum(h, 0.2 * h) * LRELU_GAIN
    w = jnp.dot(h, w2_ref[...], preferred_element_type=jnp.float32) + b2_ref[...]
    wavg = wavg_ref[...]
    o_ref[...] = (wavg + truncation * (w - wavg)).astype(o_ref.dtype)


# ============================ in-kernel helper functions ============================
def _rows_from_batch(v, hw):
    """(B, C) -> (B*hw, C): repeat each batch row hw times (row-major (b,h,w) order)."""
    b, c = v.shape
    return jnp.concatenate(
        [jnp.broadcast_to(v[i:i + 1, :], (hw, c)) for i in range(b)], axis=0)


def _shift_rows(x, k):
    """y[r] = x[r+k] (zero-filled outside range), static k."""
    if k == 0:
        return x
    n, c = x.shape
    z = jnp.zeros((abs(k), c), x.dtype)
    if k > 0:
        return jnp.concatenate([x[k:, :], z], axis=0)
    return jnp.concatenate([z, x[:n + k, :]], axis=0)


def _patches3x3(x, h, w):
    """im2col (SAME padding) for a 3x3 conv on row-major (b,h,w) x C data -> (N, 9*C)."""
    n = x.shape[0]
    lw = int(np.log2(w))                                             # h, w are powers of 2
    r = lax.broadcasted_iota(jnp.int32, (n, 1), 0)
    wi = r & (w - 1)
    hi = (r >> lw) & (h - 1)
    cols = []
    for dh in (-1, 0, 1):
        for dw in (-1, 0, 1):
            shifted = _shift_rows(x, dh * w + dw)
            ok = jnp.logical_and(
                jnp.logical_and(hi + dh >= 0, hi + dh <= h - 1),
                jnp.logical_and(wi + dw >= 0, wi + dw <= w - 1))
            cols.append(shifted * ok.astype(x.dtype))
    return jnp.concatenate(cols, axis=-1)


def _upsample_rows(x, u, batch, hw_in):
    """Nearest 2x upsample of row-major (b,h,w) x C data via 0/1 matrix u:(4*hw_in, hw_in)."""
    return jnp.concatenate(
        [jnp.dot(u, x[i * hw_in:(i + 1) * hw_in, :], preferred_element_type=jnp.float32)
         for i in range(batch)], axis=0)


# ============================== fused synthesis kernel ==============================
def synthesis_kernel(styles_ref, const_ref, noise_ref,
                     affw_ref, affb_ref,
                     convw_ref, convwsq_ref, convb_ref,
                     rgbw_ref, rgbb_ref,
                     u8_ref, u16_ref,
                     img_ref, *, batch, add_noise):
    """Entire synthesis network in one kernel; activations never leave VMEM."""

    def affine(layer_idx):                                           # style -> per-Cin scale
        return (jnp.dot(styles_ref[layer_idx], affw_ref[layer_idx],
                        preferred_element_type=jnp.float32)
                + affb_ref[layer_idx])                               # (B, CH)

    def modconv(x, conv_idx, layer_idx, h, w):
        """Fused modulated 3x3 conv: scale input by s, shared-weight matmul, scale by d."""
        hw = h * w
        n = batch * hw
        s = affine(layer_idx)                                        # (B, CH)
        xs = x * _rows_from_batch(s, hw)                             # modulate input
        patches = _patches3x3(xs, h, w).astype(jnp.bfloat16)         # (N, 9*CH)
        y = jnp.dot(patches, convw_ref[conv_idx],
                    preferred_element_type=jnp.float32)              # (N, CH), f32 accum
        d = lax.rsqrt(jnp.dot(s * s, convwsq_ref[conv_idx],
                              preferred_element_type=jnp.float32) + DEMOD_EPS)
        y = y * _rows_from_batch(d, hw)                              # demodulate output
        y = y + convb_ref[conv_idx]                                  # (1, CH) bias
        if add_noise:
            y = y + noise_ref[conv_idx][:n, :]                       # (N, 1) per-pixel noise
        return jnp.maximum(y, 0.2 * y) * LRELU_GAIN

    def torgb(x, rgb_idx, layer_idx, hw):
        """1x1 modulated conv, no demod / act / noise; output channels padded to RGB_PAD."""
        s = affine(layer_idx)
        xs = (x * _rows_from_batch(s, hw)).astype(jnp.bfloat16)
        y = jnp.dot(xs, rgbw_ref[rgb_idx], preferred_element_type=jnp.float32)
        return y + rgbb_ref[rgb_idx]                                 # (N, RGB_PAD)

    # ---------------- 4x4 block ----------------
    x = jnp.concatenate([const_ref[...]] * batch, axis=0)            # (B*16, CH)
    x = modconv(x, 0, 0, 4, 4)
    rgb = torgb(x, 0, 1, 16)

    # ---------------- 8x8 block ----------------
    x = _upsample_rows(x, u8_ref[...], batch, 16)
    rgb = _upsample_rows(rgb, u8_ref[...], batch, 16)
    x = modconv(x, 1, 2, 8, 8)
    x = modconv(x, 2, 3, 8, 8)
    rgb = rgb + torgb(x, 1, 4, 64)

    # ---------------- 16x16 block ----------------
    x = _upsample_rows(x, u16_ref[...], batch, 64)
    rgb = _upsample_rows(rgb, u16_ref[...], batch, 64)
    x = modconv(x, 3, 5, 16, 16)
    x = modconv(x, 4, 6, 16, 16)
    rgb = rgb + torgb(x, 2, 7, 256)

    img_ref[...] = rgb.astype(img_ref.dtype)                         # (B*256, RGB_PAD)


# ================================ parameter init ====================================
def _init_params():
    key = jax.random.PRNGKey(42)
    keys = iter(jax.random.split(key, 128))

    def nrm(shape, fan_in):
        return jax.random.normal(next(keys), shape, jnp.float32) / jnp.sqrt(float(fan_in))

    def conv_layer(cin, cout, k):
        return {
            "weight": nrm((cout, cin, k, k), cin * k * k),
            "bias": jnp.zeros((cout,), jnp.float32),
            "affine_w": nrm((cin, W_DIM), W_DIM),
            "affine_b": jnp.ones((cin,), jnp.float32),
            "noise_strength": jnp.float32(0.05),
        }

    return {
        "map_w0": nrm((W_DIM, Z_DIM + C_DIM), Z_DIM + C_DIM),
        "map_b0": jnp.zeros((W_DIM,), jnp.float32),
        "map_w1": nrm((W_DIM, W_DIM), W_DIM),
        "map_b1": jnp.zeros((W_DIM,), jnp.float32),
        "map_w2": nrm((W_DIM, W_DIM), W_DIM),
        "map_b2": jnp.zeros((W_DIM,), jnp.float32),
        "w_avg": jnp.zeros((W_DIM,), jnp.float32),
        "const": jax.random.normal(next(keys), (4, 4, CH), jnp.float32),
        "b4_conv1": conv_layer(CH, CH, 3),
        "b4_torgb": conv_layer(CH, IMG_CH, 1),
        "b8_conv0": conv_layer(CH, CH, 3),
        "b8_conv1": conv_layer(CH, CH, 3),
        "b8_torgb": conv_layer(CH, IMG_CH, 1),
        "b16_conv0": conv_layer(CH, CH, 3),
        "b16_conv1": conv_layer(CH, CH, 3),
        "b16_torgb": conv_layer(CH, IMG_CH, 1),
    }


def _upsample_matrix(h, w):
    """0/1 matrix mapping an (h*w)-row image to its nearest-neighbour 2x upsample."""
    u = np.zeros((4 * h * w, h * w), np.float32)
    for h2 in range(2 * h):
        for w2 in range(2 * w):
            u[h2 * (2 * w) + w2, (h2 // 2) * w + (w2 // 2)] = 1.0
    return jnp.asarray(u)


def _pack_params(p):
    """Repack raw per-layer parameters into kernel-ready stacked arrays (done once)."""
    conv_names = ("b4_conv1", "b8_conv0", "b8_conv1", "b16_conv0", "b16_conv1")
    rgb_names = ("b4_torgb", "b8_torgb", "b16_torgb")
    layer_names = ("b4_conv1", "b4_torgb", "b8_conv0", "b8_conv1", "b8_torgb",
                   "b16_conv0", "b16_conv1", "b16_torgb")

    convw, convwsq, convb, strengths = [], [], [], []
    for nm in conv_names:
        w = p[nm]["weight"]                                          # (Cout, Cin, 3, 3)
        convw.append(jnp.transpose(w, (2, 3, 1, 0)).reshape(9 * CH, CH))   # (kh,kw,Cin)xCout
        convwsq.append(jnp.transpose(jnp.sum(w * w, axis=(2, 3)), (1, 0)))  # (Cin, Cout)
        convb.append(p[nm]["bias"].reshape(1, CH))
        strengths.append(p[nm]["noise_strength"])

    rgbw, rgbb = [], []
    for nm in rgb_names:
        w = p[nm]["weight"][:, :, 0, 0]                              # (3, CH)
        rgbw.append(jnp.zeros((CH, RGB_PAD), jnp.float32).at[:, :IMG_CH].set(w.T))
        rgbb.append(jnp.zeros((1, RGB_PAD), jnp.float32).at[0, :IMG_CH].set(p[nm]["bias"]))

    return {
        "conv_w": jnp.stack(convw).astype(jnp.bfloat16),             # (5, 288, 32)
        "conv_wsq": jnp.stack(convwsq),                              # (5, 32, 32)
        "conv_b": jnp.stack(convb),                                  # (5, 1, 32)
        "rgb_w": jnp.stack(rgbw).astype(jnp.bfloat16),               # (3, 32, 8)
        "rgb_b": jnp.stack(rgbb),                                    # (3, 1, 8)
        "aff_w": jnp.stack([jnp.transpose(p[nm]["affine_w"], (1, 0))
                            for nm in layer_names]),                 # (8, W_DIM, CH)
        "aff_b": jnp.stack([p[nm]["affine_b"].reshape(1, CH)
                            for nm in layer_names]),                 # (8, 1, 32)
        "const": p["const"].reshape(16, CH),                         # (16, 32)
        "noise_strength": jnp.stack(strengths),                      # (5,)
        "u8": _upsample_matrix(4, 4),                                # (64, 16)
        "u16": _upsample_matrix(8, 8),                               # (256, 64)
        "map": {
            "w0z": jnp.transpose(p["map_w0"][:, :Z_DIM], (1, 0)),
            "w0c": jnp.transpose(p["map_w0"][:, Z_DIM:], (1, 0)),
            "b0": p["map_b0"].reshape(1, W_DIM),
            "w1": jnp.transpose(p["map_w1"], (1, 0)),
            "b1": p["map_b1"].reshape(1, W_DIM),
            "w2": jnp.transpose(p["map_w2"], (1, 0)),
            "b2": p["map_b2"].reshape(1, W_DIM),
            "w_avg": p["w_avg"].reshape(1, W_DIM),
        },
    }


# ================================ jitted wrappers ====================================
@partial(jax.jit, static_argnames=("truncation",))
def _style_impl(mp, z, c, truncation):
    w = pl.pallas_call(
        partial(mapping_kernel, truncation=float(truncation)),
        out_shape=jax.ShapeDtypeStruct((z.shape[0], W_DIM), jnp.float32),
    )(z, c, mp["w0z"], mp["w0c"], mp["b0"], mp["w1"], mp["b1"],
      mp["w2"], mp["b2"], mp["w_avg"])
    return jnp.tile(w[:, None, :], (1, NUM_WS, 1))                   # (B, NUM_WS, W_DIM)


@partial(jax.jit, static_argnames=("randomize_noise",))
def _forward_impl(packed, styles, noise_key, randomize_noise):
    b = styles.shape[0]
    if randomize_noise:
        noise = (jax.random.normal(noise_key, (N_CONV, b * MAX_HW), jnp.float32)
                 * packed["noise_strength"][:, None])[:, :, None]
    else:
        noise = jnp.zeros((N_CONV, b * MAX_HW, 1), jnp.float32)

    out = pl.pallas_call(
        partial(synthesis_kernel, batch=b, add_noise=bool(randomize_noise)),
        out_shape=jax.ShapeDtypeStruct((b * MAX_HW, RGB_PAD), jnp.float32),
        compiler_params=pltpu.CompilerParams(vmem_limit_bytes=64 * 1024 * 1024),
    )(jnp.transpose(styles, (1, 0, 2)),                              # (8, B, W_DIM)
      packed["const"], noise,
      packed["aff_w"], packed["aff_b"],
      packed["conv_w"], packed["conv_wsq"], packed["conv_b"],
      packed["rgb_w"], packed["rgb_b"],
      packed["u8"], packed["u16"])

    img = out[:, :IMG_CH].reshape(b, 16, 16, IMG_CH)                 # rows are (b,h,w)
    return jnp.transpose(img, (0, 3, 1, 2))                          # NCHW


# ================================== generator =======================================
class EG3DGeneratorPallas:
    """Pallas re-implementation of EG3DGenerator.style / EG3DGenerator.forward."""

    def __init__(self):
        self.params = _init_params()
        self.packed = _pack_params(self.params)

    # mirrors EG3DGenerator.style(z_codes, c, truncation)
    def style(self, z_codes, c, truncation=0.7):
        if isinstance(z_codes, list):
            z_codes = z_codes[0]
        return _style_impl(self.packed["map"], z_codes, c, truncation=float(truncation))

    # mirrors EG3DGenerator.forward(styles, c, truncation, randomize_noise)
    def __call__(self, styles, c=None, truncation=None, randomize_noise=True,
                 noise_key=None):
        if noise_key is None:
            noise_key = jax.random.PRNGKey(1)
        image = _forward_impl(self.packed, styles, noise_key,
                              randomize_noise=bool(randomize_noise))
        return image, None


# ===================================== main =========================================
if __name__ == "__main__":
    gen = EG3DGeneratorPallas()

    key = jax.random.PRNGKey(0)
    kz, kc, kn = jax.random.split(key, 3)
    z = jax.random.normal(kz, (2, Z_DIM), jnp.float32)       # batch of 2 latent codes
    c = jax.random.normal(kc, (1, C_DIM), jnp.float32)       # single conditioning vector

    styles = gen.style(z, c, truncation=0.7)                 # (2, NUM_WS, W_DIM)
    image, _ = gen(styles, randomize_noise=True, noise_key=kn)

    jax.block_until_ready(image)
    assert image.shape == (2, IMG_CH, 16, 16), image.shape
    assert image.dtype == jnp.float32
    print("KERNEL_OK")
</pallas_src>

<mosaic_0001>
module attributes {stable_mosaic.version = 11 : i64} {
  func.func @mapping_kernel(%arg0: memref<2x32xf32, #tpu.memory_space<vmem>>, %arg1: memref<1x16xf32, #tpu.memory_space<vmem>>, %arg2: memref<32x32xf32, #tpu.memory_space<vmem>>, %arg3: memref<16x32xf32, #tpu.memory_space<vmem>>, %arg4: memref<1x32xf32, #tpu.memory_space<vmem>>, %arg5: memref<32x32xf32, #tpu.memory_space<vmem>>, %arg6: memref<1x32xf32, #tpu.memory_space<vmem>>, %arg7: memref<32x32xf32, #tpu.memory_space<vmem>>, %arg8: memref<1x32xf32, #tpu.memory_space<vmem>>, %arg9: memref<1x32xf32, #tpu.memory_space<vmem>>, %arg10: memref<2x32xf32, #tpu.memory_space<vmem>>) attributes {dimension_semantics = [], scalar_prefetch = 0 : i64, scratch_operands = 0 : i64, tpu.core_type = #tpu.core_type<tc>} {
    %c0 = arith.constant 0 : index
    %c0_0 = arith.constant 0 : index
    %0 = vector.load %arg0[%c0, %c0_0] : memref<2x32xf32, #tpu.memory_space<vmem>>, vector<2x32xf32>
    %1 = arith.mulf %0, %0 : vector<2x32xf32>
    %cst = arith.constant dense<0.000000e+00> : vector<2xf32>
    %2 = vector.multi_reduction <add>, %1, %cst [1] : vector<2x32xf32> to vector<2xf32>
    %3 = vector.shape_cast %2 : vector<2xf32> to vector<2x1xf32>
    %cst_1 = arith.constant 3.200000e+01 : f32
    %4 = vector.broadcast %cst_1 : f32 to vector<2x1xf32>
    %5 = arith.divf %3, %4 : vector<2x1xf32>
    %cst_2 = arith.constant 9.99999993E-9 : f32
    %6 = vector.broadcast %cst_2 : f32 to vector<2x1xf32>
    %7 = arith.addf %5, %6 : vector<2x1xf32>
    %8 = math.rsqrt %7 : vector<2x1xf32>
    %9 = vector.broadcast %8 : vector<2x1xf32> to vector<2x32xf32>
    %10 = arith.mulf %0, %9 : vector<2x32xf32>
    %c0_3 = arith.constant 0 : index
    %c0_4 = arith.constant 0 : index
    %11 = vector.load %arg2[%c0_3, %c0_4] : memref<32x32xf32, #tpu.memory_space<vmem>>, vector<32x32xf32>
    %cst_5 = arith.constant dense<0.000000e+00> : vector<2x32xf32>
    %12 = tpu.matmul %10, %11, %cst_5 {dimension_numbers = #tpu.dot_dimension_numbers<[1], [0], [0], [1], [0, 0, 1, 1], [], []>} : vector<2x32xf32>, vector<32x32xf32>, vector<2x32xf32> -> vector<2x32xf32>
    %c0_6 = arith.constant 0 : index
    %c0_7 = arith.constant 0 : index
    %13 = vector.load %arg1[%c0_6, %c0_7] : memref<1x16xf32, #tpu.memory_space<vmem>>, vector<1x16xf32>
    %c0_8 = arith.constant 0 : index
    %c0_9 = arith.constant 0 : index
    %14 = vector.load %arg3[%c0_8, %c0_9] : memref<16x32xf32, #tpu.memory_space<vmem>>, vector<16x32xf32>
    %cst_10 = arith.constant dense<0.000000e+00> : vector<1x32xf32>
    %15 = tpu.matmul %13, %14, %cst_10 {dimension_numbers = #tpu.dot_dimension_numbers<[1], [0], [0], [1], [0, 0, 1, 1], [], []>} : vector<1x16xf32>, vector<16x32xf32>, vector<1x32xf32> -> vector<1x32xf32>
    %16 = vector.broadcast %15 : vector<1x32xf32> to vector<2x32xf32>
    %17 = arith.addf %12, %16 : vector<2x32xf32>
    %c0_11 = arith.constant 0 : index
    %c0_12 = arith.constant 0 : index
    %18 = vector.load %arg4[%c0_11, %c0_12] : memref<1x32xf32, #tpu.memory_space<vmem>>, vector<1x32xf32>
    %19 = vector.broadcast %18 : vector<1x32xf32> to vector<2x32xf32>
    %20 = arith.addf %17, %19 : vector<2x32xf32>
    %cst_13 = arith.constant 2.000000e-01 : f32
    %21 = vector.broadcast %cst_13 : f32 to vector<2x32xf32>
    %22 = arith.mulf %21, %20 : vector<2x32xf32>
    %23 = arith.maximumf %20, %22 : vector<2x32xf32>
    %cst_14 = arith.constant 1.41421354 : f32
    %24 = vector.broadcast %cst_14 : f32 to vector<2x32xf32>
    %25 = arith.mulf %23, %24 : vector<2x32xf32>
    %c0_15 = arith.constant 0 : index
    %c0_16 = arith.constant 0 : index
    %26 = vector.load %arg5[%c0_15, %c0_16] : memref<32x32xf32, #tpu.memory_space<vmem>>, vector<32x32xf32>
    %cst_17 = arith.constant dense<0.000000e+00> : vector<2x32xf32>
    %27 = tpu.matmul %25, %26, %cst_17 {dimension_numbers = #tpu.dot_dimension_numbers<[1], [0], [0], [1], [0, 0, 1, 1], [], []>} : vector<2x32xf32>, vector<32x32xf32>, vector<2x32xf32> -> vector<2x32xf32>
    %c0_18 = arith.constant 0 : index
    %c0_19 = arith.constant 0 : index
    %28 = vector.load %arg6[%c0_18, %c0_19] : memref<1x32xf32, #tpu.memory_space<vmem>>, vector<1x32xf32>
    %29 = vector.broadcast %28 : vector<1x32xf32> to vector<2x32xf32>
    %30 = arith.addf %27, %29 : vector<2x32xf32>
    %cst_20 = arith.constant 2.000000e-01 : f32
    %31 = vector.broadcast %cst_20 : f32 to vector<2x32xf32>
    %32 = arith.mulf %31, %30 : vector<2x32xf32>
    %33 = arith.maximumf %30, %32 : vector<2x32xf32>
    %cst_21 = arith.constant 1.41421354 : f32
    %34 = vector.broadcast %cst_21 : f32 to vector<2x32xf32>
    %35 = arith.mulf %33, %34 : vector<2x32xf32>
    %c0_22 = arith.constant 0 : index
    %c0_23 = arith.constant 0 : index
    %36 = vector.load %arg7[%c0_22, %c0_23] : memref<32x32xf32, #tpu.memory_space<vmem>>, vector<32x32xf32>
    %cst_24 = arith.constant dense<0.000000e+00> : vector<2x32xf32>
    %37 = tpu.matmul %35, %36, %cst_24 {dimension_numbers = #tpu.dot_dimension_numbers<[1], [0], [0], [1], [0, 0, 1, 1], [], []>} : vector<2x32xf32>, vector<32x32xf32>, vector<2x32xf32> -> vector<2x32xf32>
    %c0_25 = arith.constant 0 : index
    %c0_26 = arith.constant 0 : index
    %38 = vector.load %arg8[%c0_25, %c0_26] : memref<1x32xf32, #tpu.memory_space<vmem>>, vector<1x32xf32>
    %39 = vector.broadcast %38 : vector<1x32xf32> to vector<2x32xf32>
    %40 = arith.addf %37, %39 : vector<2x32xf32>
    %c0_27 = arith.constant 0 : index
    %c0_28 = arith.constant 0 : index
    %41 = vector.load %arg9[%c0_27, %c0_28] : memref<1x32xf32, #tpu.memory_space<vmem>>, vector<1x32xf32>
    %42 = vector.broadcast %41 : vector<1x32xf32> to vector<2x32xf32>
    %43 = arith.subf %40, %42 : vector<2x32xf32>
    %cst_29 = arith.constant 0.699999988 : f32
    %44 = vector.broadcast %cst_29 : f32 to vector<2x32xf32>
    %45 = arith.mulf %44, %43 : vector<2x32xf32>
    %46 = vector.broadcast %41 : vector<1x32xf32> to vector<2x32xf32>
    %47 = arith.addf %46, %45 : vector<2x32xf32>
    %c0_30 = arith.constant 0 : index
    %c0_31 = arith.constant 0 : index
    %48 = vector.load %arg10[%c0_30, %c0_31] : memref<2x32xf32, #tpu.memory_space<vmem>>, vector<2x32xf32>
    tpu.vector_store %arg10[%c0_30, %c0_31], %47 {strides = array<i32>} : memref<2x32xf32, #tpu.memory_space<vmem>>, vector<2x32xf32>,
    return
  }
}

</mosaic_0001>

<bundles_post_ra>
// kernel: _style_impl.1
= control target key start
LH: loop header
LB: loop body
LE: loop exit
PB: predicated region body
PF: predicated region fallthrough
CT: control target
= control target key end

     0   :  { %15 = vsyncpa [#allocation3], 0  ;;  %s610_s0 = inlined_call_operand.vmem [shape: f32[2,32], index: 0, kind: input, shape index: {}]   ;;  %s611_s1 = inlined_call_operand.vmem [shape: f32[1,16], index: 1, kind: input, shape index: {}]   ;;  %s612_s2 = inlined_call_operand.hbm [shape: f32[32,32], index: 2, kind: input, shape index: {}]   ;;  %s613_s3 = inlined_call_operand.hbm [shape: f32[16,32], index: 3, kind: input, shape index: {}]   ;;  %s614_s4 = inlined_call_operand.hbm [shape: f32[1,32], index: 4, kind: input, shape index: {}]   ;;  %s615_s5 = inlined_call_operand.hbm [shape: f32[32,32], index: 5, kind: input, shape index: {}]   ;;  %s616_s6 = inlined_call_operand.hbm [shape: f32[1,32], index: 6, kind: input, shape index: {}]   ;;  %s617_s7 = inlined_call_operand.hbm [shape: f32[32,32], index: 7, kind: input, shape index: {}]   ;;  %s618_s8 = inlined_call_operand.hbm [shape: f32[1,32], index: 8, kind: input, shape index: {}]   ;;  %s619_s9 = inlined_call_operand.vmem [shape: f32[1,32], index: 9, kind: input, shape index: {}]   ;;  %s620_s10 = inlined_call_operand.vmem [shape: f32[2,32], index: 10, kind: output, shape index: {}]  }
   0x1   :  { %16 = vsyncpa [#allocation5], 0 }
   0x2   :  { %17 = vsyncpa [#allocation8], 0 }
   0x3   :  { %18 = vsyncpa [#allocation11], 0  ;;  %s40_s15 = sshll.u32 %s613_s3, 4  ;;  %s507_s16 = smov [#allocation4]   ;;  %s41_s15 = int_to_ptr.hbm [resolvable:$true] %s40_s15 }
   0x4   :  { %s42_s17 = sshll.u32 %s507_s16, 4  ;;  %s64_s20 = sshll.u32 %s615_s5, 4  ;;  %s43_s17 = int_to_ptr.vmem [resolvable:$true] %s42_s17  ;;  %s65_s20 = int_to_ptr.hbm [resolvable:$true] %s64_s20 }
   0x5   :  { %s508_s21 = smov 128   ;;  %s509_s22 = smov 8  }
   0x6   :  { %48 = dma.hbm_to_vmem [thread:$0]  %s41_s15, 256, %s43_s17, [#allocation5], %s508_s21, %s508_s21, %s509_s22  }
   0x7   :  { %s510_s23 = smov [#allocation7]   ;;  %s88_s27 = sshll.u32 %s617_s7, 4  ;;  %s89_s27 = int_to_ptr.hbm [resolvable:$true] %s88_s27 }
   0x8   :  { %s66_s24 = sshll.u32 %s510_s23, 4  ;;  %s27_s29 = sshll.u32 %s612_s2, 4  ;;  %s67_s24 = int_to_ptr.vmem [resolvable:$true] %s66_s24  ;;  %s28_s29 = int_to_ptr.hbm [resolvable:$true] %s27_s29 }
   0x9   :  { %72 = dma.hbm_to_vmem [thread:$0]  %s65_s20, 512, %s67_s24, [#allocation8], %s508_s21, %s508_s21, %s509_s22  }
   0xa   :  { %s511_s30 = smov [#allocation10]   ;;  %s512_s5 = smov [#allocation2]  }
   0xb   :  { %s90_s11 = sshll.u32 %s511_s30, 4  ;;  %s29_s12 = sshll.u32 %s512_s5, 4  ;;  %s91_s11 = int_to_ptr.vmem [resolvable:$true] %s90_s11  ;;  %s30_s12 = int_to_ptr.vmem [resolvable:$true] %s29_s12 }
   0xc   :  { %96 = dma.hbm_to_vmem [thread:$0]  %s89_s27, 512, %s91_s11, [#allocation11], %s508_s21, %s508_s21, %s509_s22  }
   0xd   :  { %s54_s15 = sshll.u32 %s614_s4, 4  ;;  %s78_s17 = sshll.u32 %s616_s6, 4  ;;  %s55_s15 = int_to_ptr.hbm [resolvable:$true] %s54_s15  ;;  %s79_s17 = int_to_ptr.hbm [resolvable:$true] %s78_s17 }
   0xe   :  { %35 = dma.hbm_to_vmem [thread:$0]  %s28_s29, 512, %s30_s12, [#allocation3], %s508_s21, %s508_s21, %s509_s22  }
   0xf   :  { %s513_s18 = smov [#allocation6]   ;;  %s514_s19 = smov [#allocation9]  }
  0x10   :  { %s56_s2 = sshll.u32 %s513_s18, 4  ;;  %s80_s20 = sshll.u32 %s514_s19, 4  ;;  %s57_s2 = int_to_ptr.vmem [resolvable:$true] %s56_s2  ;;  %s81_s20 = int_to_ptr.vmem [resolvable:$true] %s80_s20 }
  0x11   :  { %59 = dma.hbm_to_vmem [thread:$0]  %s55_s15, 16, %s57_s2, [#allocation5]  }
  0x12   :  { %s102_s25 = sshll.u32 %s618_s8, 4  ;;  %s515_s4 = smov [#allocation12]   ;;  %s103_s25 = int_to_ptr.hbm [resolvable:$true] %s102_s25 }
  0x13   :  { %83 = dma.hbm_to_vmem [thread:$0]  %s79_s17, 16, %s81_s20, [#allocation8]  }
  0x14   :  { %s104_s21 = sshll.u32 %s515_s4, 4  ;;  %s105_s21 = int_to_ptr.vmem [resolvable:$true] %s104_s21 }
  0x15   :  { %107 = dma.hbm_to_vmem [thread:$0]  %s103_s25, 16, %s105_s21, [#allocation11]  }
  0x16   :  { %499 = dma.done.wait [#allocation3], 512  }
  0x17   :  { %500 = vsyncadd [#allocation3], 4294966784 }
  0x18   :  { %501 = dma.done.wait [#allocation5], 272  }
  0x19   :  { %502 = vsyncadd [#allocation5], 4294967024 }
  0x1a   :  { %503 = dma.done.wait [#allocation8], 528  }
  0x1b   :  { %504 = vsyncadd [#allocation8], 4294966768 }
  0x1c   :  { %505 = dma.done.wait [#allocation11], 528  }
  0x1d   :  { %506 = vsyncadd [#allocation11], 4294966768  ;;  %vm140_vm0 = vcmask 254976   ;;  %v138_v0 = vld [vmem:[%s610_s0] sm:$0x3]  ;;  %v516_v3 = vmov 32.0  }
  0x1e   :  { %v139_v1 = vmul.f32 %v138_v0, %v138_v0  ;;  %327 = vrcp.f32 %v516_v3  ;;  %v167_v6 = vld [vmem:[#allocation2 + $0x18] sm:$0xff]  ;;  %v170_v8 = vld [vmem:[#allocation4 + $0x8] sm:$0xff]  ;;  %v166_v9 = vld [vmem:[#allocation2 + $0x10] sm:$0xff]  ;;  %vm171_vm1 = vcmask 130048   ;;  %vm196_vm6 = vcmask 261120  }
  0x1f   :  { %212 = vmatpush.msra.mxu1 %v167_v6  ;;  %v169_v10 = vld [vmem:[#allocation4] sm:$0xff]  ;;  %189 = vmatpush.msra.mxu0 %v170_v8  ;;  %v165_v11 = vld [vmem:[#allocation2 + $0x8] sm:$0xff]  ;;  %v228_v31 = vld [vmem:[#allocation7] sm:$0xff] }
  0x20   :  { %v141_v2 = vsel %vm140_vm0, %v139_v1, 0.0  ;;  %v168_v12 = vld [vmem:[%s611_s1] sm:$0x1]  ;;  %v231_v28 = vld [vmem:[#allocation7 + $0x18] sm:$0xff]  ;;  %v230_v29 = vld [vmem:[#allocation7 + $0x10] sm:$0xff] }
  0x21   :  { %142 = vadd.xlane.f32.xlu0 %v141_v2  ;;  %213 = vmatpush.msra.mxu1 %v166_v9  ;;  %v164_v13 = vld [vmem:[#allocation2] sm:$0xff]  ;;  %v323_v34 = vld [vmem:[#allocation6] ss:$0 sm:$0xff]  ;;  %v262_v44 = vld [vmem:[#allocation10] sm:$0xff] }
  0x22   :  { %190 = vmatpush.msra.mxu0 %v169_v10  ;;  %251 = vmatpush.msra.mxu2 %v231_v28  ;;  %v229_v30 = vld [vmem:[#allocation7 + $0x8] sm:$0xff]  ;;  %v265_v41 = vld [vmem:[#allocation10 + $0x18] sm:$0xff]  ;;  %v264_v42 = vld [vmem:[#allocation10 + $0x10] sm:$0xff] }
  0x23   :  { %214 = vmatpush.msra.mxu1 %v165_v11  ;;  %309 = vmatmul.msk.f32.vlgmr.msra.gmra.mxu0 %vm171_vm1, %v168_v12  ;;  %v263_v43 = vld [vmem:[#allocation10 + $0x8] sm:$0xff]  ;;  %v324_v45 = vld [vmem:[#allocation9] ss:$0 sm:$0xff]  ;;  %v325_v51 = vld [vmem:[#allocation12] ss:$0 sm:$0xff] }
  0x24   :  { %v328_v4 = vpop.eup %327  ;;  %252 = vmatpush.msra.mxu2 %v230_v29  ;;  %285 = vmatpush.msra.mxu3 %v265_v41  ;;  %v326_v52 = vld [vmem:[%s619_s9] ss:$0 sm:$0xff] }
  0x25   :  { %v145_v5 = vmul.f32 32.0, %v328_v4  ;;  %215 = vmatpush.msra.mxu1 %v164_v13  ;;  %vm149_vm2 = vweird.f32 %v328_v4 }
  0x26   :  { %253 = vmatpush.msra.mxu2 %v229_v30  ;;  %286 = vmatpush.msra.mxu3 %v264_v42 }
  0x27   :  { %v146_v7 = vsub.f32 1.0, %v145_v5 }
  0x28   :  { %254 = vmatpush.msra.mxu2 %v228_v31  ;;  %287 = vmatpush.msra.mxu3 %v263_v43 }
  0x29   :  { %v147_v14 = vmul.f32 %v328_v4, %v146_v7 }
  0x2a   :  { %288 = vmatpush.msra.mxu3 %v262_v44 }
  0x2b   :  { %v148_v15 = vadd.f32 %v328_v4, %v147_v14 }
  0x2d   :  { %v150_v16 = vsel %vm149_vm2, %v328_v4, %v148_v15 }
  0x94   :  { %v143_v17 = vpop.xlane.xlu0 %142 }
  0x95   :  { %v151_v18 = vmul.f32 %v150_v16, %v143_v17 }
  0x97   :  { %v152_v19 = vadd.f32 1e-08, %v151_v18 }
  0x99   :  { %329 = vrsqrt.f32 %v152_v19  ;;  %vm159_vm4 = vweird.f32 %v152_v19 }
  0x9f   :  { %v330_v20 = vpop.eup %329 }
  0xa0   :  { %v154_v21 = vmul.f32 %v330_v20, %v152_v19  ;;  %vm160_vm3 = vweird.f32 %v330_v20  ;;  %v192_v32 = vpop.f32.mrf.mxu0 }
  0xa1   :  { %vm161_vm5 = vmor %vm159_vm4, %vm160_vm3  ;;  %v195_v33 = vperm.slane %v192_v32, 0 }
  0xa2   :  { %v155_v22 = vmul.f32 %v330_v20, %v154_v21 }
  0xa4   :  { %v156_v23 = vmul.f32 0.5, %v155_v22 }
  0xa6   :  { %v157_v24 = vsub.f32 1.5, %v156_v23 }
  0xa8   :  { %v158_v25 = vmul.f32 %v330_v20, %v157_v24 }
  0xaa   :  { %v162_v26 = vsel %vm161_vm5, %v330_v20, %v158_v25 }
  0xab   :  { %v163_v27 = vmul.f32 %v162_v26, %v138_v0 }
  0xad   :  { %310 = vmatmul.msk.f32.vlgmr.msra.gmra.mxu1 %vm196_vm6, %v163_v27 }
 0x12a   :  { %v217_v35 = vpop.f32.mrf.mxu1 }
 0x12b   :  { %v218_v36 = vadd.f32 %v217_v35, %v195_v33 }
 0x12d   :  { %v224_v37 = vadd.f32 %v323_v34, %v218_v36 }
 0x12f   :  { %v225_v38 = vmul.f32 0.2, %v224_v37 }
 0x131   :  { %v226_v39 = vmax.f32 %v224_v37, %v225_v38 }
 0x133   :  { %v227_v40 = vmul.f32 1.4142135, %v226_v39 }
 0x135   :  { %311 = vmatmul.msk.f32.vlgmr.msra.gmra.mxu2 %vm196_vm6, %v227_v40 }
 0x1b8   :  { %v256_v46 = vpop.f32.mrf.mxu2 }
 0x1b9   :  { %v257_v47 = vadd.f32 %v324_v45, %v256_v46 }
 0x1bb   :  { %v259_v48 = vmul.f32 0.2, %v257_v47 }
 0x1bd   :  { %v260_v49 = vmax.f32 %v257_v47, %v259_v48 }
 0x1bf   :  { %v261_v50 = vmul.f32 1.4142135, %v260_v49 }
 0x1c1   :  { %312 = vmatmul.msk.f32.vlgmr.msra.gmra.mxu3 %vm196_vm6, %v261_v50 }
 0x244   :  { %v290_v53 = vpop.f32.mrf.mxu3 }
 0x245   :  { %v291_v54 = vadd.f32 %v325_v51, %v290_v53 }
 0x247   :  { %v297_v55 = vsub.f32 %v291_v54, %v326_v52 }
 0x249   :  { %v298_v56 = vmul.f32 0.7, %v297_v55 }
 0x24b   :  { %v299_v57 = vadd.f32 %v326_v52, %v298_v56 }
 0x24d   :  { %300 = vst.msk [vmem:[%s620_s10] sm:$0x3] %vm140_vm0, %v299_v57 }
 0x24e   :  { %305 = vsyncpa [#allocation3], 1 }
 0x24f   :  { %306 = vsyncpa [#allocation5], 1 }
 0x250   :  { %307 = vsyncpa [#allocation8], 1 }
 0x251   :  { %308 = vsyncpa [#allocation11], 1 }

</bundles_post_ra>
